<compile_context>
chip_gen: v7x
topology: tpu7x:2x2x1
jax: 0.10.0
libtpu: 0.0.40
codegen_flags: <defaults>
</compile_context>

<pallas_src>
import jax
import jax.numpy as jnp
from jax.experimental import pallas as pl
from jax.experimental.pallas import tpu as pltpu

AXES = (0, 2, 1)  # the permutation used by Permute in bendr.py

_MAX_TILE_BYTES = 4 * 1024 * 1024       # per-tile cap (input side), fits v7x VMEM
_MIN_PALLAS_BYTES = 128 * 1024          # below this, pallas_call overhead dominates
_VMEM_LIMIT_BYTES = 32 * 1024 * 1024    # explicit scoped-VMEM budget with headroom


def _permute_kernel(x_ref, o_ref):
    # x_ref: (C, Tt) block in VMEM ; o_ref: (Tt, C) block in VMEM.
    # 2-D transpose on (8,128)-aligned tiles -> native XLU vxpose path.
    o_ref[...] = x_ref[...].T


def _pick_t_tile(C, T, itemsize, max_tile=512):
    """Largest multiple of 128 that divides T, capped by max_tile and VMEM budget."""
    tt = min(max_tile, T)
    tt -= tt % 128
    tt = max(tt, 128)
    while tt > 128 and (T % tt != 0 or C * tt * itemsize > _MAX_TILE_BYTES):
        tt -= 128
    return tt


def permute_021(x: jax.Array) -> jax.Array:
    """Pallas equivalent of torch.Tensor.permute([0, 2, 1]) on a (B, C, T) array.

    Requires C % 128 == 0 and T % 128 == 0 (lane-dense, unmasked stores).
    """
    B, C, T = x.shape
    itemsize = jnp.dtype(x.dtype).itemsize
    tt = _pick_t_tile(C, T, itemsize)

    out_shape = jax.ShapeDtypeStruct((B, T, C), x.dtype)

    return pl.pallas_call(
        _permute_kernel,
        out_shape=out_shape,
        grid=(B, T // tt),
        in_specs=[
            pl.BlockSpec((pl.Squeezed(), C, tt), lambda b, t: (b, 0, t)),
        ],
        out_specs=pl.BlockSpec((pl.Squeezed(), tt, C), lambda b, t: (b, t, 0)),
        compiler_params=pltpu.CompilerParams(
            dimension_semantics=("parallel", "parallel"),
            vmem_limit_bytes=_VMEM_LIMIT_BYTES,
        ),
    )(x)


def _pallas_eligible(x) -> bool:
    if x.ndim != 3:
        return False
    B, C, T = x.shape
    itemsize = jnp.dtype(x.dtype).itemsize
    if itemsize not in (1, 2, 4):
        return False
    # Lane-dense output (last dim C) and 128-aligned T tiles; covers the
    # (8,128)/(16,128)/(32,128) sublane-packing rules for f32/bf16/int8.
    if C % 128 != 0 or T % 128 != 0:
        return False
    # Small tensors: launch + per-step overhead dwarfs the copy; let XLA do it.
    if B * C * T * itemsize < _MIN_PALLAS_BYTES:
        return False
    return True


class Permute:
    """Mirror of the PyTorch module; only axes=(0,2,1) on eligible shapes hits Pallas."""

    def __init__(self, axes):
        self.axes = tuple(axes)

    def __call__(self, x):
        if self.axes == AXES and _pallas_eligible(x):
            return permute_021(x)
        # General axes / small or misaligned shapes: plain JAX transpose
        # (== torch.permute semantics).
        return jnp.transpose(x, self.axes)


if __name__ == "__main__":
    mod = Permute([0, 2, 1])

    # 1) BENDR-style tiny activation (B=2, C=4, T=16): lane-sparse, takes the
    #    jnp.transpose fallback by design.
    x_small = jax.random.normal(jax.random.PRNGKey(0), (2, 4, 16), dtype=jnp.float32)
    y_small = jax.block_until_ready(mod(x_small))
    assert y_small.shape == (2, 16, 4)
    assert jnp.array_equal(y_small, jnp.transpose(x_small, (0, 2, 1)))

    # 2) Lane-dense shape that exercises the tiled Pallas kernel (f32).
    B, C, T = 2, 128, 512
    x = jax.random.normal(jax.random.PRNGKey(0), (B, C, T), dtype=jnp.float32)
    assert _pallas_eligible(x)
    y = jax.block_until_ready(mod(x))
    ref = jnp.transpose(x, (0, 2, 1))
    assert y.shape == (B, T, C)
    assert y.dtype == x.dtype
    assert jnp.array_equal(y, ref), "Pallas permute mismatch vs reference (f32)"

    # 3) bf16 path (sublane-packed pairs; C, Tt multiples of 128 keep it native).
    x_bf = jax.random.normal(jax.random.PRNGKey(0), (2, 128, 256)).astype(jnp.bfloat16)
    assert _pallas_eligible(x_bf)
    y_bf = jax.block_until_ready(mod(x_bf))
    assert jnp.array_equal(y_bf, jnp.transpose(x_bf, (0, 2, 1))), "bf16 mismatch"

    print("KERNEL_OK")
</pallas_src>

<mosaic_0001>
module attributes {stable_mosaic.version = 11 : i64} {
  func.func @_permute_kernel(%arg0: i32, %arg1: i32, %arg2: memref<1x128x512xf32, #tpu.memory_space<vmem>>, %arg3: memref<1x512x128xf32, #tpu.memory_space<vmem>>) attributes {dimension_semantics = [#tpu.dimension_semantics<parallel>, #tpu.dimension_semantics<parallel>], iteration_bounds = array<i64: 2, 1>, scalar_prefetch = 0 : i64, scratch_operands = 0 : i64, tpu.core_type = #tpu.core_type<tc>, window_params = [{transform_indices = @transform_0, window_bounds = array<i64: 1, 128, 512>}, {transform_indices = @transform_1, window_bounds = array<i64: 1, 512, 128>}]} {
    %c0 = arith.constant 0 : index
    %c0_0 = arith.constant 0 : index
    %c0_1 = arith.constant 0 : index
    %0 = vector.load %arg2[%c0, %c0_0, %c0_1] : memref<1x128x512xf32, #tpu.memory_space<vmem>>, vector<1x128x512xf32>
    %1 = vector.shape_cast %0 : vector<1x128x512xf32> to vector<128x512xf32>
    %2 = tpu.transpose %1, [1, 0] : vector<128x512xf32> -> vector<512x128xf32>
    %c0_2 = arith.constant 0 : index
    %c0_3 = arith.constant 0 : index
    %c0_4 = arith.constant 0 : index
    %3 = vector.load %arg3[%c0_2, %c0_3, %c0_4] : memref<1x512x128xf32, #tpu.memory_space<vmem>>, vector<1x512x128xf32>
    %4 = vector.shape_cast %3 : vector<1x512x128xf32> to vector<512x128xf32>
    %5 = vector.shape_cast %2 : vector<512x128xf32> to vector<1x512x128xf32>
    tpu.vector_store %arg3[%c0_2, %c0_3, %c0_4], %5 {strides = array<i32>} : memref<1x512x128xf32, #tpu.memory_space<vmem>>, vector<1x512x128xf32>,
    return
  }
  func.func @transform_0(%arg0: i32, %arg1: i32) -> (i32, i32, i32) {
    %c0_i32 = arith.constant 0 : i32
    %c0_i32_0 = arith.constant 0 : i32
    return %arg0, %c0_i32, %arg1 : i32, i32, i32
  }
  func.func @transform_1(%arg0: i32, %arg1: i32) -> (i32, i32, i32) {
    %c0_i32 = arith.constant 0 : i32
    %c0_i32_0 = arith.constant 0 : i32
    return %arg0, %arg1, %c0_i32 : i32, i32, i32
  }
}

</mosaic_0001>

<bundles_post_ra>
// kernel: tpu_custom_call.1
= control target key start
LH: loop header
LB: loop body
LE: loop exit
PB: predicated region body
PF: predicated region fallthrough
CT: control target
= control target key end

     0   :  { %6 = vsyncpa [#allocation3], 0  ;;  %s1039_s0 = inlined_call_operand.hbm [shape: f32[2,128,512], index: 0, kind: input, shape index: {}]   ;;  %s1040_s1 = inlined_call_operand.hbm [shape: f32[2,512,128], index: 1, kind: output, shape index: {}]  }
   0x1   :  { %8 = vsyncpa [#allocation3 + $0x1], 0 }
   0x2   :  { %9 = vsyncpa [#allocation4], 0 }
   0x3   :  { %11 = vsyncpa [#allocation4 + $0x1], 0  ;;  %s727_s6 = smov 0   ;;  %s729_s7 = smov 0  }
   0x4   :  { %s731_s8 = smov 0   ;;  %s733_s9 = smov 0  }
   0x5   :  { %s735_s10 = smov 0   ;;  %s737_s11 = smov 0  }
   0x6 LB: > { %s514_s12 = sadd.s32 4294967295, %s709_s11   ;;  %s515_s13 = sadd.s32 4294967294, %s709_s11   ;;  %s709_s11 = sphi %s737_s11, %s17_s11   ;;  %s705_s10 = sphi %s735_s10, %s1055_s10   ;;  %s701_s9 = sphi %s733_s9, %s1054_s9   ;;  %s697_s8 = sphi %s731_s8, %s1053_s8   ;;  %s693_s7 = sphi %s729_s7, %s1052_s7   ;;  %s689_s6 = sphi %s727_s6, %s1051_s6  }
   0x7   : > { %s29_s14 = sadd.s32 1, %s705_s10  ;;  %s38_s15 = sadd.s32 1, %s697_s8 }
   0x8   : > { %p31_p0 = scmp.ge.s32.totalorder %s29_s14, 2  ;;  %p45_p1 = scmp.ne.s32.totalorder %s697_s8, %s693_s7 }
   0x9   : > { %p46_p2 = scmp.eq.s32.totalorder %s709_s11, 0  ;;  %p51_p3 = scmp.ne.s32.totalorder %s693_s7, %s689_s6 }
   0xa   : > { %s1057_s14 = smov (%p31_p0, %s29_s14), 0  ;;  %p52_p5 = scmp.eq.s32.totalorder %s514_s12, 0 }
   0xb   : > { %p768_p4 = por %p46_p2, %p45_p1  ;;  %s33_s17 = ssub.s32 %s705_s10, %s1057_s14 }
   0xc   : > { %p77_p6 = scmp.eq.s32.totalorder %s514_s12, 1  ;;  %p36_p7 = scmp.eq.s32.totalorder %s33_s17, 0 }
   0xd   : > { %p774_p8 = por %p52_p5, %p51_p3  ;;  %p83_p10 = scmp.eq.s32.totalorder %s515_s13, 1 }
   0xe   : > { %p778_p9 = por %p77_p6, %p45_p1  ;;  %p543_p13 = scmp.lt.s32.totalorder %s709_s11, 2 }
   0xf   : > { %s783_s20 = scalar_select %p36_p7, %s697_s8, %s38_s15  }
  0x10   : > { %s1044_s19 = scalar_select %p778_p9, 1, 0 }
  0x11   : > { %p785_p11 = por %p83_p10, %p51_p3  ;;  %s103_s22 = sand.u32 1, %s697_s8  }
  0x12   : > { %s518_s23 = sshll.u32 %s103_s22, 9  ;;  %s529_s24 = sshll.u32 %s705_s10, 13 }
  0x13   : > { %s1045_s21 = scalar_select %p785_p11, 1, 0 }
  0x14   : > { %s796_s27 = scalar_lea.hbm %s1039_s0, %s529_s24  ;;  %s107_s28 = scalar_lea.vmem [#allocation2], %s518_s23 }
  0x15   : > { %s116_s29 = sshll.u32 %s107_s28, 4  ;;  %p802_p0 = pnand %p543_p13, %p768_p4  ;;  %s798_s29 = int_to_ptr.vmem [resolvable:$true] %s116_s29 }
  0x16   : > { %s807_s2 = scalar_lea.sflag [#allocation3], %s103_s22  ;;  %s597_s3 = scalar_lea.hbm %s796_s27, 8192 }
  0x17   : > { %p598_p2 = scmp.ne.s32.totalorder %s796_s27, %s597_s3  ;;  %p599_p3 = pneg %p802_p0 }
  0x18   : > { %s602_s12 = scalar_lea.hbm %s1039_s0, 16384  ;;  %p603_p4 = scmp.lt.u32.totalorder %s796_s27, %s1039_s0 }
  0x19   : > { %p600_p5 = pnand %p599_p3, %p598_p2  ;;  %p604_p7 = scmp.lt.u32.totalorder %s602_s12, %s597_s3 }
  0x1a   : > { %p606_p13 = scmp.lt.u32.totalorder %s597_s3, %s796_s27 }
  0x1b   : > { %p601_p6 = pneg %p600_p5  ;;  %p605_p10 = por %p604_p7, %p603_p4 }
  0x1d   : > { %p607_p12 = por %p606_p13, %p605_p10 }
  0x1f   : > { %p608_p1 = pnand %p607_p12, %p601_p6 }
  0x21   : > { %611 = shalt.err (!%p608_p1)
}
  0x22   : > { %s612_s16 = scalar_lea.vmem %s798_s29, 8192  ;;  %s711_s17 = smov [#allocation2]  }
  0x23   : > { %p613_p2 = scmp.ne.s32.totalorder %s798_s29, %s612_s16  ;;  %s617_s22 = sshll.u32 %s711_s17, 4  ;;  %s618_s22 = int_to_ptr.vmem [resolvable:$false] %s617_s22 }
  0x24   : > { %s619_s23 = scalar_lea.vmem %s618_s22, 16384  ;;  %p620_p9 = scmp.lt.s32.totalorder %s798_s29, %s618_s22 }
  0x25   : > { %p615_p5 = pnand %p613_p2, %p599_p3  ;;  %p621_p4 = scmp.lt.s32.totalorder %s619_s23, %s612_s16 }
  0x27   : > { %p616_p11 = pneg %p615_p5  ;;  %p622_p7 = por %p621_p4, %p620_p9 }
  0x29   : > { %p623_p10 = pnand %p622_p7, %p616_p11 }
  0x2b   : > { %626 = shalt.err (!%p623_p10)
}
  0x2c   : > { %s712_s24 = smov 512   ;;  %s713_s25 = smov 32  }
  0x2d   : > { %538 = dma.hbm_to_vmem [thread:$0]  (!%p802_p0), %s796_s27, 8192, %s798_s29, %s807_s2, %s712_s24, %s712_s24, %s713_s25  }
  0x2e   : > { %p124_p12 = scmp.lt.s32.totalorder %s709_s11, 3  ;;  %p1047_p1 = scmp.ge.s32.totalorder %s709_s11, 1 }
  0x30   : > { %p125_p3 = pnand %p1047_p1, %p124_p12 }
  0x31   : > { %s839_s26 = sand.u32 (!%p125_p3), 1, %s693_s7  }
  0x32   : > { %128 = sbr.rel (%p125_p3) target bundleno = 327 (0x147), region = 24  ;;  %s522_s28 = sshll.u32 (!%p125_p3), %s839_s26, 9 }
  0x33   : > { %s131_s3 = scalar_lea.sflag (!%p125_p3), [#allocation3], %s839_s26  ;;  %s845_s4 = scalar_lea.vmem (!%p125_p3), [#allocation2], %s522_s28 }
  0x39   : > { %680 = dma.done.wait (%p774_p8), %s131_s3, 8192  }
  0x3a   : > { %682 = vsyncadd (%p774_p8), %s131_s3, 4294959104  ;;  %v156_v0 = vld [vmem:[%s845_s4 + $0x8] sm:$0xff]  ;;  %v155_v1 = vld [vmem:[%s845_s4] sm:$0xff]  ;;  %s917_s18 = scalar_lea.vmem [#allocation5], %s522_s28  ;;  %s530_s27 = sshll.u32 %s701_s9, 13 }
  0x3b   : > { %251 = vxpose.xlu1.b32.start [1/16] %v156_v0, 128  ;;  %219 = vxpose.xlu0.b32.start [1/16] %v155_v1, 128  ;;  %v160_v2 = vld [vmem:[%s845_s4 + $0x28] sm:$0xff]  ;;  %v159_v3 = vld [vmem:[%s845_s4 + $0x20] sm:$0xff]  ;;  %v158_v32 = vld [vmem:[%s845_s4 + $0x18] sm:$0xff]  ;;  %s427_s29 = sshll.u32 %s917_s18, 4  ;;  %s986_s5 = scalar_lea.hbm %s1040_s1, %s530_s27  ;;  %s988_s29 = int_to_ptr.vmem [resolvable:$true] %s427_s29 }
  0x3c   : > { %v164_v4 = vld [vmem:[%s845_s4 + $0x48] sm:$0xff]  ;;  %v163_v5 = vld [vmem:[%s845_s4 + $0x40] sm:$0xff]  ;;  %v157_v33 = vld [vmem:[%s845_s4 + $0x10] sm:$0xff]  ;;  %s412_s9 = scalar_lea.sflag [#allocation4], %s839_s26  ;;  %s627_s12 = scalar_lea.vmem %s988_s29, 8192 }
  0x3d   : > { %v168_v6 = vld [vmem:[%s845_s4 + $0x68] sm:$0xff]  ;;  %v167_v7 = vld [vmem:[%s845_s4 + $0x60] sm:$0xff]  ;;  %v162_v34 = vld [vmem:[%s845_s4 + $0x38] sm:$0xff]  ;;  %p628_p8 = scmp.ne.s32.totalorder %s988_s29, %s627_s12  ;;  %p1048_p9 = scmp.ne.s32.totalorder %s1044_s19, 0 }
  0x3e   : > { %v172_v8 = vld [vmem:[%s845_s4 + $0x88] sm:$0xff]  ;;  %v171_v9 = vld [vmem:[%s845_s4 + $0x80] sm:$0xff]  ;;  %v161_v35 = vld [vmem:[%s845_s4 + $0x30] sm:$0xff]  ;;  %s714_s13 = smov [#allocation5]  }
  0x3f   : > { %252 = vxpose.xlu1.b32.cont [2/16] %v160_v2, 128  ;;  %220 = vxpose.xlu0.b32.cont [2/16] %v159_v3, 128  ;;  %v176_v10 = vld [vmem:[%s845_s4 + $0xa8] sm:$0xff]  ;;  %v175_v11 = vld [vmem:[%s845_s4 + $0xa0] sm:$0xff]  ;;  %v166_v36 = vld [vmem:[%s845_s4 + $0x58] sm:$0xff]  ;;  %p629_p11 = pnand %p628_p8, %p1048_p9  ;;  %s631_s15 = sshll.u32 %s714_s13, 4  ;;  %s632_s15 = int_to_ptr.vmem [resolvable:$false] %s631_s15 }
  0x40   : > { %v180_v12 = vld [vmem:[%s845_s4 + $0xc8] sm:$0xff]  ;;  %v179_v13 = vld [vmem:[%s845_s4 + $0xc0] sm:$0xff]  ;;  %v165_v37 = vld [vmem:[%s845_s4 + $0x50] sm:$0xff]  ;;  %s633_s16 = scalar_lea.vmem %s632_s15, 16384  ;;  %p634_p6 = scmp.lt.s32.totalorder %s988_s29, %s632_s15 }
  0x41   : > { %v184_v14 = vld [vmem:[%s845_s4 + $0xe8] sm:$0xff]  ;;  %v183_v15 = vld [vmem:[%s845_s4 + $0xe0] sm:$0xff]  ;;  %v170_v38 = vld [vmem:[%s845_s4 + $0x78] sm:$0xff]  ;;  %p630_p0 = pneg %p629_p11  ;;  %p635_p13 = scmp.lt.s32.totalorder %s633_s16, %s627_s12 }
  0x42   : > { %v188_v16 = vld [vmem:[%s845_s4 + $0x108] sm:$0xff]  ;;  %v187_v17 = vld [vmem:[%s845_s4 + $0x100] sm:$0xff]  ;;  %v169_v39 = vld [vmem:[%s845_s4 + $0x70] sm:$0xff] }
  0x43   : > { %253 = vxpose.xlu1.b32.cont [3/16] %v164_v4, 128  ;;  %221 = vxpose.xlu0.b32.cont [3/16] %v163_v5, 128  ;;  %v192_v18 = vld [vmem:[%s845_s4 + $0x128] sm:$0xff]  ;;  %v191_v19 = vld [vmem:[%s845_s4 + $0x120] sm:$0xff]  ;;  %v174_v40 = vld [vmem:[%s845_s4 + $0x98] sm:$0xff]  ;;  %p636_p2 = por %p635_p13, %p634_p6 }
  0x44   : > { %v196_v20 = vld [vmem:[%s845_s4 + $0x148] sm:$0xff]  ;;  %v195_v21 = vld [vmem:[%s845_s4 + $0x140] sm:$0xff]  ;;  %v173_v41 = vld [vmem:[%s845_s4 + $0x90] sm:$0xff] }
  0x45   : > { %v200_v22 = vld [vmem:[%s845_s4 + $0x168] sm:$0xff]  ;;  %v199_v23 = vld [vmem:[%s845_s4 + $0x160] sm:$0xff]  ;;  %v178_v42 = vld [vmem:[%s845_s4 + $0xb8] sm:$0xff]  ;;  %p637_p5 = pnand %p636_p2, %p630_p0 }
  0x46   : > { %v204_v24 = vld [vmem:[%s845_s4 + $0x188] sm:$0xff]  ;;  %v203_v25 = vld [vmem:[%s845_s4 + $0x180] sm:$0xff]  ;;  %v177_v43 = vld [vmem:[%s845_s4 + $0xb0] sm:$0xff] }
  0x47   : > { %254 = vxpose.xlu1.b32.cont [4/16] %v168_v6, 128  ;;  %222 = vxpose.xlu0.b32.cont [4/16] %v167_v7, 128  ;;  %v208_v26 = vld [vmem:[%s845_s4 + $0x1a8] sm:$0xff]  ;;  %v207_v27 = vld [vmem:[%s845_s4 + $0x1a0] sm:$0xff]  ;;  %v182_v44 = vld [vmem:[%s845_s4 + $0xd8] sm:$0xff] }
  0x48   : > { %v212_v28 = vld [vmem:[%s845_s4 + $0x1c8] sm:$0xff]  ;;  %v211_v29 = vld [vmem:[%s845_s4 + $0x1c0] sm:$0xff]  ;;  %v181_v45 = vld [vmem:[%s845_s4 + $0xd0] sm:$0xff] }
  0x49   : > { %v216_v30 = vld [vmem:[%s845_s4 + $0x1e8] sm:$0xff]  ;;  %v215_v31 = vld [vmem:[%s845_s4 + $0x1e0] sm:$0xff]  ;;  %v186_v46 = vld [vmem:[%s845_s4 + $0xf8] sm:$0xff] }
  0x4a   : > { %v185_v47 = vld [vmem:[%s845_s4 + $0xf0] sm:$0xff]  ;;  %v190_v48 = vld [vmem:[%s845_s4 + $0x118] sm:$0xff] }
  0x4b   : > { %255 = vxpose.xlu1.b32.cont [5/16] %v172_v8, 128  ;;  %223 = vxpose.xlu0.b32.cont [5/16] %v171_v9, 128  ;;  %v189_v49 = vld [vmem:[%s845_s4 + $0x110] sm:$0xff]  ;;  %v194_v50 = vld [vmem:[%s845_s4 + $0x138] sm:$0xff] }
  0x4c   : > { %v193_v51 = vld [vmem:[%s845_s4 + $0x130] sm:$0xff]  ;;  %v198_v52 = vld [vmem:[%s845_s4 + $0x158] sm:$0xff] }
  0x4d   : > { %v197_v53 = vld [vmem:[%s845_s4 + $0x150] sm:$0xff]  ;;  %v202_v54 = vld [vmem:[%s845_s4 + $0x178] sm:$0xff] }
  0x4e   : > { %v201_v55 = vld [vmem:[%s845_s4 + $0x170] sm:$0xff]  ;;  %v206_v56 = vld [vmem:[%s845_s4 + $0x198] sm:$0xff] }
  0x4f   : > { %256 = vxpose.xlu1.b32.cont [6/16] %v176_v10, 128  ;;  %224 = vxpose.xlu0.b32.cont [6/16] %v175_v11, 128  ;;  %v205_v57 = vld [vmem:[%s845_s4 + $0x190] sm:$0xff]  ;;  %v210_v58 = vld [vmem:[%s845_s4 + $0x1b8] sm:$0xff] }
  0x50   : > { %v209_v59 = vld [vmem:[%s845_s4 + $0x1b0] sm:$0xff]  ;;  %v214_v60 = vld [vmem:[%s845_s4 + $0x1d8] sm:$0xff] }
  0x51   : > { %v213_v61 = vld [vmem:[%s845_s4 + $0x1d0] sm:$0xff]  ;;  %v218_v62 = vld [vmem:[%s845_s4 + $0x1f8] sm:$0xff] }
  0x52   : > { %v217_v63 = vld [vmem:[%s845_s4 + $0x1f0] sm:$0xff] }
  0x53   : > { %257 = vxpose.xlu1.b32.cont [7/16] %v180_v12, 128  ;;  %225 = vxpose.xlu0.b32.cont [7/16] %v179_v13, 128 }
  0x57   : > { %258 = vxpose.xlu1.b32.cont [8/16] %v184_v14, 128  ;;  %226 = vxpose.xlu0.b32.cont [8/16] %v183_v15, 128 }
  0x5b   : > { %259 = vxpose.xlu1.b32.cont [9/16] %v188_v16, 128  ;;  %227 = vxpose.xlu0.b32.cont [9/16] %v187_v17, 128 }
  0x5f   : > { %260 = vxpose.xlu1.b32.cont [10/16] %v192_v18, 128  ;;  %228 = vxpose.xlu0.b32.cont [10/16] %v191_v19, 128 }
  0x63   : > { %261 = vxpose.xlu1.b32.cont [11/16] %v196_v20, 128  ;;  %229 = vxpose.xlu0.b32.cont [11/16] %v195_v21, 128 }
  0x67   : > { %262 = vxpose.xlu1.b32.cont [12/16] %v200_v22, 128  ;;  %230 = vxpose.xlu0.b32.cont [12/16] %v199_v23, 128 }
  0x6b   : > { %263 = vxpose.xlu1.b32.cont [13/16] %v204_v24, 128  ;;  %231 = vxpose.xlu0.b32.cont [13/16] %v203_v25, 128 }
  0x6f   : > { %264 = vxpose.xlu1.b32.cont [14/16] %v208_v26, 128  ;;  %232 = vxpose.xlu0.b32.cont [14/16] %v207_v27, 128 }
  0x73   : > { %265 = vxpose.xlu1.b32.cont [15/16] %v212_v28, 128  ;;  %233 = vxpose.xlu0.b32.cont [15/16] %v211_v29, 128 }
  0x77   : > { %266 = vxpose.xlu1.b32.end [16/16] %v216_v30, 128  ;;  %234 = vxpose.xlu0.b32.end [16/16] %v215_v31, 128 }
  0x7b   : > { %315 = vxpose.xlu1.b32.start [1/16] %v158_v32, 128  ;;  %283 = vxpose.xlu0.b32.start [1/16] %v157_v33, 128 }
  0x7f   : > { %316 = vxpose.xlu1.b32.cont [2/16] %v162_v34, 128  ;;  %284 = vxpose.xlu0.b32.cont [2/16] %v161_v35, 128 }
  0x83   : > { %317 = vxpose.xlu1.b32.cont [3/16] %v166_v36, 128  ;;  %285 = vxpose.xlu0.b32.cont [3/16] %v165_v37, 128 }
  0x87   : > { %318 = vxpose.xlu1.b32.cont [4/16] %v170_v38, 128  ;;  %286 = vxpose.xlu0.b32.cont [4/16] %v169_v39, 128 }
  0x8b   : > { %319 = vxpose.xlu1.b32.cont [5/16] %v174_v40, 128  ;;  %287 = vxpose.xlu0.b32.cont [5/16] %v173_v41, 128 }
  0x8f   : > { %320 = vxpose.xlu1.b32.cont [6/16] %v178_v42, 128  ;;  %288 = vxpose.xlu0.b32.cont [6/16] %v177_v43, 128 }
  0x93   : > { %321 = vxpose.xlu1.b32.cont [7/16] %v182_v44, 128  ;;  %289 = vxpose.xlu0.b32.cont [7/16] %v181_v45, 128 }
  0x97   : > { %322 = vxpose.xlu1.b32.cont [8/16] %v186_v46, 128  ;;  %290 = vxpose.xlu0.b32.cont [8/16] %v185_v47, 128 }
  0x9b   : > { %323 = vxpose.xlu1.b32.cont [9/16] %v190_v48, 128  ;;  %291 = vxpose.xlu0.b32.cont [9/16] %v189_v49, 128 }
  0x9f   : > { %324 = vxpose.xlu1.b32.cont [10/16] %v194_v50, 128  ;;  %292 = vxpose.xlu0.b32.cont [10/16] %v193_v51, 128 }
  0xa3   : > { %325 = vxpose.xlu1.b32.cont [11/16] %v198_v52, 128  ;;  %293 = vxpose.xlu0.b32.cont [11/16] %v197_v53, 128 }
  0xa7   : > { %326 = vxpose.xlu1.b32.cont [12/16] %v202_v54, 128  ;;  %294 = vxpose.xlu0.b32.cont [12/16] %v201_v55, 128 }
  0xab   : > { %327 = vxpose.xlu1.b32.cont [13/16] %v206_v56, 128  ;;  %295 = vxpose.xlu0.b32.cont [13/16] %v205_v57, 128 }
  0xaf   : > { %328 = vxpose.xlu1.b32.cont [14/16] %v210_v58, 128  ;;  %296 = vxpose.xlu0.b32.cont [14/16] %v209_v59, 128 }
  0xb3   : > { %329 = vxpose.xlu1.b32.cont [15/16] %v214_v60, 128  ;;  %297 = vxpose.xlu0.b32.cont [15/16] %v213_v61, 128 }
  0xb7   : > { %330 = vxpose.xlu1.b32.end [16/16] %v218_v62, 128  ;;  %298 = vxpose.xlu0.b32.end [16/16] %v217_v63, 128 }
  0xbb   : > { %v267_v0 = vpop.trf.xlu1  ;;  %v235_v1 = vpop.trf.xlu0 }
  0xbc   : > { %363 = vst [vmem:[%s917_s18 + $0x80] sm:$0xff] %v267_v0  ;;  %347 = vst [vmem:[%s917_s18] sm:$0xff] %v235_v1 }
  0xbf   : > { %v268_v2 = vpop.trf.xlu1  ;;  %v236_v3 = vpop.trf.xlu0 }
  0xc0   : > { %364 = vst [vmem:[%s917_s18 + $0x88] sm:$0xff] %v268_v2  ;;  %348 = vst [vmem:[%s917_s18 + $0x8] sm:$0xff] %v236_v3 }
  0xc3   : > { %v269_v4 = vpop.trf.xlu1  ;;  %v237_v5 = vpop.trf.xlu0 }
  0xc4   : > { %365 = vst [vmem:[%s917_s18 + $0x90] sm:$0xff] %v269_v4  ;;  %349 = vst [vmem:[%s917_s18 + $0x10] sm:$0xff] %v237_v5 }
  0xc7   : > { %v270_v6 = vpop.trf.xlu1  ;;  %v238_v7 = vpop.trf.xlu0 }
  0xc8   : > { %366 = vst [vmem:[%s917_s18 + $0x98] sm:$0xff] %v270_v6  ;;  %350 = vst [vmem:[%s917_s18 + $0x18] sm:$0xff] %v238_v7 }
  0xcb   : > { %v271_v8 = vpop.trf.xlu1  ;;  %v239_v9 = vpop.trf.xlu0 }
  0xcc   : > { %367 = vst [vmem:[%s917_s18 + $0xa0] sm:$0xff] %v271_v8  ;;  %351 = vst [vmem:[%s917_s18 + $0x20] sm:$0xff] %v239_v9 }
  0xcf   : > { %v272_v10 = vpop.trf.xlu1  ;;  %v240_v11 = vpop.trf.xlu0 }
  0xd0   : > { %368 = vst [vmem:[%s917_s18 + $0xa8] sm:$0xff] %v272_v10  ;;  %352 = vst [vmem:[%s917_s18 + $0x28] sm:$0xff] %v240_v11 }
  0xd3   : > { %v273_v12 = vpop.trf.xlu1  ;;  %v241_v13 = vpop.trf.xlu0 }
  0xd4   : > { %369 = vst [vmem:[%s917_s18 + $0xb0] sm:$0xff] %v273_v12  ;;  %353 = vst [vmem:[%s917_s18 + $0x30] sm:$0xff] %v241_v13 }
  0xd7   : > { %v274_v14 = vpop.trf.xlu1  ;;  %v242_v15 = vpop.trf.xlu0 }
  0xd8   : > { %370 = vst [vmem:[%s917_s18 + $0xb8] sm:$0xff] %v274_v14  ;;  %354 = vst [vmem:[%s917_s18 + $0x38] sm:$0xff] %v242_v15 }
  0xdb   : > { %v275_v16 = vpop.trf.xlu1  ;;  %v243_v17 = vpop.trf.xlu0 }
  0xdc   : > { %371 = vst [vmem:[%s917_s18 + $0xc0] sm:$0xff] %v275_v16  ;;  %355 = vst [vmem:[%s917_s18 + $0x40] sm:$0xff] %v243_v17 }
  0xdf   : > { %v276_v18 = vpop.trf.xlu1  ;;  %v244_v19 = vpop.trf.xlu0 }
  0xe0   : > { %372 = vst [vmem:[%s917_s18 + $0xc8] sm:$0xff] %v276_v18  ;;  %356 = vst [vmem:[%s917_s18 + $0x48] sm:$0xff] %v244_v19 }
  0xe3   : > { %v277_v20 = vpop.trf.xlu1  ;;  %v245_v21 = vpop.trf.xlu0 }
  0xe4   : > { %373 = vst [vmem:[%s917_s18 + $0xd0] sm:$0xff] %v277_v20  ;;  %357 = vst [vmem:[%s917_s18 + $0x50] sm:$0xff] %v245_v21 }
  0xe7   : > { %v278_v22 = vpop.trf.xlu1  ;;  %v246_v23 = vpop.trf.xlu0 }
  0xe8   : > { %374 = vst [vmem:[%s917_s18 + $0xd8] sm:$0xff] %v278_v22  ;;  %358 = vst [vmem:[%s917_s18 + $0x58] sm:$0xff] %v246_v23 }
  0xeb   : > { %v279_v24 = vpop.trf.xlu1  ;;  %v247_v25 = vpop.trf.xlu0 }
  0xec   : > { %375 = vst [vmem:[%s917_s18 + $0xe0] sm:$0xff] %v279_v24  ;;  %359 = vst [vmem:[%s917_s18 + $0x60] sm:$0xff] %v247_v25 }
  0xef   : > { %v280_v26 = vpop.trf.xlu1  ;;  %v248_v27 = vpop.trf.xlu0 }
  0xf0   : > { %376 = vst [vmem:[%s917_s18 + $0xe8] sm:$0xff] %v280_v26  ;;  %360 = vst [vmem:[%s917_s18 + $0x68] sm:$0xff] %v248_v27 }
  0xf3   : > { %v281_v28 = vpop.trf.xlu1  ;;  %v249_v29 = vpop.trf.xlu0 }
  0xf4   : > { %377 = vst [vmem:[%s917_s18 + $0xf0] sm:$0xff] %v281_v28  ;;  %361 = vst [vmem:[%s917_s18 + $0x70] sm:$0xff] %v249_v29 }
  0xf7   : > { %v282_v30 = vpop.trf.xlu1  ;;  %v250_v31 = vpop.trf.xlu0 }
  0xf8   : > { %378 = vst [vmem:[%s917_s18 + $0xf8] sm:$0xff] %v282_v30  ;;  %362 = vst [vmem:[%s917_s18 + $0x78] sm:$0xff] %v250_v31 }
  0xfb   : > { %v331_v32 = vpop.trf.xlu1  ;;  %v299_v33 = vpop.trf.xlu0 }
  0xfc   : > { %395 = vst [vmem:[%s917_s18 + $0x180] sm:$0xff] %v331_v32  ;;  %379 = vst [vmem:[%s917_s18 + $0x100] sm:$0xff] %v299_v33 }
  0xff   : > { %v332_v34 = vpop.trf.xlu1  ;;  %v300_v35 = vpop.trf.xlu0 }
 0x100   : > { %396 = vst [vmem:[%s917_s18 + $0x188] sm:$0xff] %v332_v34  ;;  %380 = vst [vmem:[%s917_s18 + $0x108] sm:$0xff] %v300_v35 }
 0x103   : > { %v333_v36 = vpop.trf.xlu1  ;;  %v301_v37 = vpop.trf.xlu0 }
 0x104   : > { %397 = vst [vmem:[%s917_s18 + $0x190] sm:$0xff] %v333_v36  ;;  %381 = vst [vmem:[%s917_s18 + $0x110] sm:$0xff] %v301_v37 }
 0x107   : > { %v334_v38 = vpop.trf.xlu1  ;;  %v302_v39 = vpop.trf.xlu0 }
 0x108   : > { %398 = vst [vmem:[%s917_s18 + $0x198] sm:$0xff] %v334_v38  ;;  %382 = vst [vmem:[%s917_s18 + $0x118] sm:$0xff] %v302_v39 }
 0x10b   : > { %v335_v40 = vpop.trf.xlu1  ;;  %v303_v41 = vpop.trf.xlu0 }
 0x10c   : > { %399 = vst [vmem:[%s917_s18 + $0x1a0] sm:$0xff] %v335_v40  ;;  %383 = vst [vmem:[%s917_s18 + $0x120] sm:$0xff] %v303_v41 }
 0x10f   : > { %v336_v42 = vpop.trf.xlu1  ;;  %v304_v43 = vpop.trf.xlu0 }
 0x110   : > { %400 = vst [vmem:[%s917_s18 + $0x1a8] sm:$0xff] %v336_v42  ;;  %384 = vst [vmem:[%s917_s18 + $0x128] sm:$0xff] %v304_v43 }
 0x113   : > { %v337_v44 = vpop.trf.xlu1  ;;  %v305_v45 = vpop.trf.xlu0 }
 0x114   : > { %401 = vst [vmem:[%s917_s18 + $0x1b0] sm:$0xff] %v337_v44  ;;  %385 = vst [vmem:[%s917_s18 + $0x130] sm:$0xff] %v305_v45 }
 0x117   : > { %v338_v46 = vpop.trf.xlu1  ;;  %v306_v47 = vpop.trf.xlu0 }
 0x118   : > { %402 = vst [vmem:[%s917_s18 + $0x1b8] sm:$0xff] %v338_v46  ;;  %386 = vst [vmem:[%s917_s18 + $0x138] sm:$0xff] %v306_v47 }
 0x11b   : > { %v339_v48 = vpop.trf.xlu1  ;;  %v307_v49 = vpop.trf.xlu0 }
 0x11c   : > { %403 = vst [vmem:[%s917_s18 + $0x1c0] sm:$0xff] %v339_v48  ;;  %387 = vst [vmem:[%s917_s18 + $0x140] sm:$0xff] %v307_v49 }
 0x11f   : > { %v340_v50 = vpop.trf.xlu1  ;;  %v308_v51 = vpop.trf.xlu0 }
 0x120   : > { %404 = vst [vmem:[%s917_s18 + $0x1c8] sm:$0xff] %v340_v50  ;;  %388 = vst [vmem:[%s917_s18 + $0x148] sm:$0xff] %v308_v51 }
 0x123   : > { %v341_v52 = vpop.trf.xlu1  ;;  %v309_v53 = vpop.trf.xlu0 }
 0x124   : > { %405 = vst [vmem:[%s917_s18 + $0x1d0] sm:$0xff] %v341_v52  ;;  %389 = vst [vmem:[%s917_s18 + $0x150] sm:$0xff] %v309_v53 }
 0x127   : > { %v342_v54 = vpop.trf.xlu1  ;;  %v310_v55 = vpop.trf.xlu0 }
 0x128   : > { %406 = vst [vmem:[%s917_s18 + $0x1d8] sm:$0xff] %v342_v54  ;;  %390 = vst [vmem:[%s917_s18 + $0x158] sm:$0xff] %v310_v55 }
 0x12b   : > { %v343_v56 = vpop.trf.xlu1  ;;  %v311_v57 = vpop.trf.xlu0 }
 0x12c   : > { %407 = vst [vmem:[%s917_s18 + $0x1e0] sm:$0xff] %v343_v56  ;;  %391 = vst [vmem:[%s917_s18 + $0x160] sm:$0xff] %v311_v57 }
 0x12f   : > { %v344_v58 = vpop.trf.xlu1  ;;  %v312_v59 = vpop.trf.xlu0 }
 0x130   : > { %408 = vst [vmem:[%s917_s18 + $0x1e8] sm:$0xff] %v344_v58  ;;  %392 = vst [vmem:[%s917_s18 + $0x168] sm:$0xff] %v312_v59 }
 0x133   : > { %v345_v60 = vpop.trf.xlu1  ;;  %v313_v61 = vpop.trf.xlu0 }
 0x134   : > { %409 = vst [vmem:[%s917_s18 + $0x1f0] sm:$0xff] %v345_v60  ;;  %393 = vst [vmem:[%s917_s18 + $0x170] sm:$0xff] %v313_v61 }
 0x137   : > { %v346_v62 = vpop.trf.xlu1  ;;  %v314_v63 = vpop.trf.xlu0 }
 0x138   : > { %410 = vst [vmem:[%s917_s18 + $0x1f8] sm:$0xff] %v346_v62  ;;  %394 = vst [vmem:[%s917_s18 + $0x178] sm:$0xff] %v314_v63 }
 0x139   : > { %640 = shalt.err (!%p637_p5)
}
 0x13a   : > { %s641_s17 = scalar_lea.hbm %s986_s5, 8192  ;;  %s645_s24 = scalar_lea.hbm %s1040_s1, 16384 }
 0x13b   : > { %p642_p4 = scmp.ne.s32.totalorder %s986_s5, %s641_s17  ;;  %p646_p12 = scmp.lt.u32.totalorder %s986_s5, %s1040_s1 }
 0x13c   : > { %p647_p1 = scmp.lt.u32.totalorder %s645_s24, %s641_s17  ;;  %p649_p8 = scmp.lt.u32.totalorder %s641_s17, %s986_s5 }
 0x13d   : > { %p643_p7 = pnand %p642_p4, %p1048_p9 }
 0x13e   : > { %p648_p3 = por %p647_p1, %p646_p12 }
 0x13f   : > { %p644_p10 = pneg %p643_p7 }
 0x140   : > { %p650_p11 = por %p649_p8, %p648_p3 }
 0x142   : > { %p651_p0 = pnand %p650_p11, %p644_p10 }
 0x144   : > { %654 = shalt.err (!%p651_p0)
}
 0x145   : > { %s715_s3 = smov 128   ;;  %s716_s4 = smov 8  }
 0x146   : > { %533 = dma.vmem_to_hbm [thread:$0]  (%p1048_p9), %s988_s29, 8192, %s986_s5, %s412_s9, %s715_s3, %s715_s3, %s716_s4  }
 0x147 PF: > { %s442_s18 = sand.u32 1, %s689_s6   ;;  %p1049_p6 = scmp.ne.s32.totalorder %s1045_s21, 0 }
 0x148   : > { %p1050_p13 = scmp.ge.s32.totalorder %s709_s11, 2  ;;  %s443_s27 = scalar_lea.sflag [#allocation4], %s442_s18 }
 0x14a   : > { %p540_p2 = pnand %p1050_p13, %p1049_p6 }
 0x14c   : > { %684 = dma.done.wait (!%p540_p2), %s443_s27, 8192  }
 0x14d   : > { %686 = vsyncadd (!%p540_p2), %s443_s27, 4294959104  ;;  %s17_s11 = sadd.s32 1, %s709_s11   ;;  %s1051_s6 = smov %s693_s7 }
 0x14e   : > { %p14_p5 = scmp.ge.s32.totalorder %s17_s11, 4   ;;  %s1052_s7 = smov %s697_s8 }
 0x14f   : > { %s1053_s8 = smov %s783_s20  ;;  %s1054_s9 = smov %s705_s10 }
 0x150   : > { %s1055_s10 = smov %s1057_s14  ;;  %16 = sbr.rel (!%p14_p5) target bundleno = 6 (0x6), region = 69 }
 0x157   :  { %448 = vsyncpa [#allocation3], 1 }
 0x158   :  { %450 = vsyncpa [#allocation3 + $0x1], 1 }
 0x159   :  { %451 = vsyncpa [#allocation4], 1 }
 0x15a   :  { %453 = vsyncpa [#allocation4 + $0x1], 1 }

</bundles_post_ra>
